<compile_context>
chip_gen: v7x
topology: tpu7x:2x2x1
jax: 0.10.0
libtpu: 0.0.40
codegen_flags: <defaults>
</compile_context>

<pallas_src>
import jax
import jax.numpy as jnp
from jax.experimental import pallas as pl
from jax.experimental.pallas import tpu as pltpu

# ---- packed-parameter slab layout (static) ----------------------------------
_IN_DIMS    = (3, 15, 25, 5)      # fan-in  of fc1..fc4
_OUT_DIMS   = (15, 25, 5, 1)      # fan-out of fc1..fc4
_W_ROWS     = (0, 16, 48, 56)     # sublane offset of each weight block (8-aligned)
_B_ROWS     = (64, 80, 112, 120)  # sublane offset of each bias column  (8-aligned)
_SLAB_SHAPE = (128, 32)           # rows x lanes; 16 KB of f32, one DMA


def mlp_kernel(x_ref, p_ref, o_ref):
    # x_ref: (3, tile)   -- batch packed densely along lanes.
    # p_ref: (128, 32)   -- all weights & biases in one slab.
    # o_ref: (1, tile)   -- lane-dense output slab.
    z = x_ref[...].astype(jnp.float32)
    for li in range(4):
        out_d, in_d = _OUT_DIMS[li], _IN_DIMS[li]
        wr, br = _W_ROWS[li], _B_ROWS[li]
        w = p_ref[wr:wr + out_d, 0:in_d]          # (out, in), static slice
        b = p_ref[br:br + out_d, 0:1]             # (out, 1), lane-broadcast
        z = jnp.dot(w, z, preferred_element_type=jnp.float32) + b
        if li < 3:                                # ReLU on fc1..fc3 only
            z = jnp.maximum(z, 0.0)
    o_ref[...] = z.astype(o_ref.dtype)


def pack_params(params):
    """Pack fc1..fc4 weights (out, in) and biases into one (128, 32) f32 slab."""
    slab = jnp.zeros(_SLAB_SHAPE, jnp.float32)
    for li in range(4):
        w = jnp.asarray(params[f"w{li + 1}"], jnp.float32)             # (out, in)
        b = jnp.asarray(params[f"b{li + 1}"], jnp.float32).reshape(-1, 1)
        slab = slab.at[_W_ROWS[li]:_W_ROWS[li] + w.shape[0], 0:w.shape[1]].set(w)
        slab = slab.at[_B_ROWS[li]:_B_ROWS[li] + b.shape[0], 0:1].set(b)
    return slab


def _choose_tiling(batch, *, max_tile=1024):
    """Pad batch to a multiple of 128 lanes and pick the lane tile.

    Single-TC chips (v5e/v6e): one grid step whenever the padded batch fits in
    a <= max_tile lane tile.  v7x (2 TensorCores): even block count so both
    cores get equal work.  Intermediates live in vregs, so tile is capped at
    1024 lanes to avoid spills; VMEM is irrelevant at this size.
    """
    b_pad = max(-(-batch // 128) * 128, 128)
    try:
        kind = jax.devices()[0].device_kind.lower()
        two_tc = "v7" in kind                      # v7x has 2 TCs per chip
    except Exception:
        two_tc = False
    if not two_tc:
        tile = min(b_pad, max_tile)
    else:
        n_blocks = max(2, 2 * (-(-b_pad // (2 * max_tile))))
        b_pad = -(-b_pad // (n_blocks * 128)) * (n_blocks * 128)
        tile = b_pad // n_blocks
    b_pad = -(-b_pad // tile) * tile
    return b_pad, tile


@jax.jit
def mlp_forward(x, param_slab):
    """x: (B, 3) float32, param_slab: (128, 32) from pack_params. Returns (B, 1)."""
    B = x.shape[0]
    b_pad, tile = _choose_tiling(B)

    # Transpose to (3, B) and zero-pad the lane (batch) dim; fused under jit.
    xt = x.T
    if b_pad != B:
        xt = jnp.pad(xt, ((0, 0), (0, b_pad - B)))

    out = pl.pallas_call(
        mlp_kernel,
        out_shape=jax.ShapeDtypeStruct((1, b_pad), x.dtype),
        grid_spec=pl.GridSpec(
            grid=(b_pad // tile,),
            in_specs=[
                pl.BlockSpec((3, tile), lambda i: (0, i)),
                pl.BlockSpec(_SLAB_SHAPE, lambda i: (0, 0)),   # resident, 1 DMA
            ],
            out_specs=pl.BlockSpec((1, tile), lambda i: (0, i)),
        ),
        compiler_params=pltpu.CompilerParams(
            dimension_semantics=("parallel",)),
    )(xt, param_slab)

    # (1, b_pad) -> (B, 1): slice + reshape (no relayout transpose).
    return out[0, :B].reshape(B, 1)


def init_params(key):
    """Deterministic init matching nn.Linear layer shapes: W (out, in), b (out, 1)."""
    dims = [(3, 15), (15, 25), (25, 5), (5, 1)]
    params = {}
    for idx, (fan_in, fan_out) in enumerate(dims, start=1):
        key, kw, kb = jax.random.split(key, 3)
        bound = 1.0 / jnp.sqrt(fan_in)
        params[f"w{idx}"] = jax.random.uniform(kw, (fan_out, fan_in), jnp.float32,
                                               -bound, bound)
        params[f"b{idx}"] = jax.random.uniform(kb, (fan_out, 1), jnp.float32,
                                               -bound, bound)
    return params


def mlp_reference(x, params):
    z = x
    for i in range(1, 4):
        z = jnp.maximum(z @ params[f"w{i}"].T + params[f"b{i}"].reshape(1, -1), 0.0)
    return z @ params["w4"].T + params["b4"].reshape(1, -1)


if __name__ == "__main__":
    key = jax.random.PRNGKey(0)
    kp, kx = jax.random.split(key)
    params = init_params(kp)
    slab = pack_params(params)

    # Small, non-multiple-of-128 batch exercises the padding path.
    B = 200
    x = jax.random.normal(kx, (B, 3), jnp.float32)

    out = jax.block_until_ready(mlp_forward(x, slab))
    ref = mlp_reference(x, params)

    assert out.shape == (B, 1)
    assert jnp.allclose(out, ref, atol=1e-5, rtol=1e-5), "mismatch vs reference"

    print("KERNEL_OK")
</pallas_src>

<mosaic_0001>
module attributes {stable_mosaic.version = 11 : i64} {
  func.func @mlp_kernel(%arg0: i32, %arg1: memref<3x256xf32, #tpu.memory_space<vmem>>, %arg2: memref<128x32xf32, #tpu.memory_space<vmem>>, %arg3: memref<1x256xf32, #tpu.memory_space<vmem>>) attributes {dimension_semantics = [#tpu.dimension_semantics<parallel>], iteration_bounds = array<i64: 1>, scalar_prefetch = 0 : i64, scratch_operands = 0 : i64, tpu.core_type = #tpu.core_type<tc>, window_params = [{transform_indices = @transform_0, window_bounds = array<i64: 3, 256>}, {pipeline_mode = #tpu.pipeline_mode<synchronous>, transform_indices = @transform_1, window_bounds = array<i64: 128, 32>}, {transform_indices = @transform_2, window_bounds = array<i64: 1, 256>}]} {
    %c0 = arith.constant 0 : index
    %c0_0 = arith.constant 0 : index
    %0 = vector.load %arg1[%c0, %c0_0] : memref<3x256xf32, #tpu.memory_space<vmem>>, vector<3x256xf32>
    %c0_1 = arith.constant 0 : index
    %c0_2 = arith.constant 0 : index
    %1 = vector.load %arg2[%c0_1, %c0_2] : memref<128x32xf32, #tpu.memory_space<vmem>>, vector<15x3xf32>
    %c64 = arith.constant 64 : index
    %c0_3 = arith.constant 0 : index
    %2 = vector.load %arg2[%c64, %c0_3] : memref<128x32xf32, #tpu.memory_space<vmem>>, vector<15x1xf32>
    %cst = arith.constant dense<0.000000e+00> : vector<15x256xf32>
    %3 = tpu.matmul %1, %0, %cst {dimension_numbers = #tpu.dot_dimension_numbers<[1], [0], [0], [1], [0, 0, 1, 1], [], []>} : vector<15x3xf32>, vector<3x256xf32>, vector<15x256xf32> -> vector<15x256xf32>
    %4 = vector.broadcast %2 : vector<15x1xf32> to vector<15x256xf32>
    %5 = arith.addf %3, %4 : vector<15x256xf32>
    %cst_4 = arith.constant 0.000000e+00 : f32
    %6 = vector.broadcast %cst_4 : f32 to vector<15x256xf32>
    %7 = arith.maximumf %5, %6 : vector<15x256xf32>
    %c16 = arith.constant 16 : index
    %c0_5 = arith.constant 0 : index
    %8 = vector.load %arg2[%c16, %c0_5] : memref<128x32xf32, #tpu.memory_space<vmem>>, vector<25x15xf32>
    %c80 = arith.constant 80 : index
    %c0_6 = arith.constant 0 : index
    %9 = vector.load %arg2[%c80, %c0_6] : memref<128x32xf32, #tpu.memory_space<vmem>>, vector<25x1xf32>
    %cst_7 = arith.constant dense<0.000000e+00> : vector<25x256xf32>
    %10 = tpu.matmul %8, %7, %cst_7 {dimension_numbers = #tpu.dot_dimension_numbers<[1], [0], [0], [1], [0, 0, 1, 1], [], []>} : vector<25x15xf32>, vector<15x256xf32>, vector<25x256xf32> -> vector<25x256xf32>
    %11 = vector.broadcast %9 : vector<25x1xf32> to vector<25x256xf32>
    %12 = arith.addf %10, %11 : vector<25x256xf32>
    %cst_8 = arith.constant 0.000000e+00 : f32
    %13 = vector.broadcast %cst_8 : f32 to vector<25x256xf32>
    %14 = arith.maximumf %12, %13 : vector<25x256xf32>
    %c48 = arith.constant 48 : index
    %c0_9 = arith.constant 0 : index
    %15 = vector.load %arg2[%c48, %c0_9] : memref<128x32xf32, #tpu.memory_space<vmem>>, vector<5x25xf32>
    %c112 = arith.constant 112 : index
    %c0_10 = arith.constant 0 : index
    %16 = vector.load %arg2[%c112, %c0_10] : memref<128x32xf32, #tpu.memory_space<vmem>>, vector<5x1xf32>
    %cst_11 = arith.constant dense<0.000000e+00> : vector<5x256xf32>
    %17 = tpu.matmul %15, %14, %cst_11 {dimension_numbers = #tpu.dot_dimension_numbers<[1], [0], [0], [1], [0, 0, 1, 1], [], []>} : vector<5x25xf32>, vector<25x256xf32>, vector<5x256xf32> -> vector<5x256xf32>
    %18 = vector.broadcast %16 : vector<5x1xf32> to vector<5x256xf32>
    %19 = arith.addf %17, %18 : vector<5x256xf32>
    %cst_12 = arith.constant 0.000000e+00 : f32
    %20 = vector.broadcast %cst_12 : f32 to vector<5x256xf32>
    %21 = arith.maximumf %19, %20 : vector<5x256xf32>
    %c56 = arith.constant 56 : index
    %c0_13 = arith.constant 0 : index
    %22 = vector.load %arg2[%c56, %c0_13] : memref<128x32xf32, #tpu.memory_space<vmem>>, vector<1x5xf32>
    %c120 = arith.constant 120 : index
    %c0_14 = arith.constant 0 : index
    %23 = vector.load %arg2[%c120, %c0_14] : memref<128x32xf32, #tpu.memory_space<vmem>>, vector<1x1xf32>
    %cst_15 = arith.constant dense<0.000000e+00> : vector<1x256xf32>
    %24 = tpu.matmul %22, %21, %cst_15 {dimension_numbers = #tpu.dot_dimension_numbers<[1], [0], [0], [1], [0, 0, 1, 1], [], []>} : vector<1x5xf32>, vector<5x256xf32>, vector<1x256xf32> -> vector<1x256xf32>
    %25 = vector.broadcast %23 : vector<1x1xf32> to vector<1x256xf32>
    %26 = arith.addf %24, %25 : vector<1x256xf32>
    %c0_16 = arith.constant 0 : index
    %c0_17 = arith.constant 0 : index
    %27 = vector.load %arg3[%c0_16, %c0_17] : memref<1x256xf32, #tpu.memory_space<vmem>>, vector<1x256xf32>
    tpu.vector_store %arg3[%c0_16, %c0_17], %26 {strides = array<i32>} : memref<1x256xf32, #tpu.memory_space<vmem>>, vector<1x256xf32>,
    return
  }
  func.func @transform_0(%arg0: i32) -> (i32, i32) {
    %c0_i32 = arith.constant 0 : i32
    %c0_i32_0 = arith.constant 0 : i32
    return %c0_i32, %arg0 : i32, i32
  }
  func.func @transform_1(%arg0: i32) -> (i32, i32) {
    %c0_i32 = arith.constant 0 : i32
    %c0_i32_0 = arith.constant 0 : i32
    %c0_i32_1 = arith.constant 0 : i32
    return %c0_i32, %c0_i32_0 : i32, i32
  }
  func.func @transform_2(%arg0: i32) -> (i32, i32) {
    %c0_i32 = arith.constant 0 : i32
    %c0_i32_0 = arith.constant 0 : i32
    return %c0_i32, %arg0 : i32, i32
  }
}

</mosaic_0001>

<bundles_post_ra>
// kernel: mlp_forward.1
= control target key start
LH: loop header
LB: loop body
LE: loop exit
PB: predicated region body
PF: predicated region fallthrough
CT: control target
= control target key end

     0   :  { %vm35_vm0 = vcmask 1042432   ;;  %v512_v1 = vmov 0.0   ;;  %v513_v2 = vmov 0   ;;  %vm28_vm1 = vcmask 23552   ;;  %s595_s0 = inlined_call_operand.vmem [shape: f32[3,256], index: 0, kind: input, shape index: {}]   ;;  %s596_s1 = inlined_call_operand.vmem [shape: f32[128,32], index: 1, kind: input, shape index: {}]   ;;  %s597_s2 = inlined_call_operand.vmem [shape: f32[1,256], index: 2, kind: output, shape index: {}]  }
   0x1   :  { %v11_v0 = vld [vmem:[%s595_s0] sm:$0x77]  ;;  %104 = vmatprep.mubr.f32.mxu0 %v512_v1  ;;  %509 = vset.pattern.permute.xlu0 %v513_v2  ;;  %v15_v6 = vld [vmem:[%s596_s1 + $0x48] sm:$0x7f]  ;;  %v267_v9 = vld [vmem:[%s596_s1 + $0x70] sm:$0x1f] }
   0x2   :  { %v27_v3 = vcombine.high %v11_v0, %v11_v0  ;;  %v14_v4 = vld [vmem:[%s596_s1 + $0x40] sm:$0xff]  ;;  %233 = vmatprep.mubr.f32.mxu1 %v512_v1  ;;  %510 = vset.pattern.permute.xlu1 %v513_v2  ;;  %v13_v7 = vld [vmem:[%s596_s1 + $0x8] sm:$0x7f]  ;;  %v125_v10 = vld [vmem:[%s596_s1 + $0x50] sm:$0xff]  ;;  %vm162_vm2 = vcmask 1046528   ;;  %vm514_vm3 = vmmov 1  }
   0x3   :  { %v12_v5 = vld [vmem:[%s596_s1] sm:$0xff]  ;;  %18 = vperm.xlu0 %509, %v14_v4   ;;  %131 = vperm.xlu1 %510, %v125_v10   ;;  %v126_v11 = vld [vmem:[%s596_s1 + $0x58] sm:$0xff]  ;;  %v128_v12 = vld [vmem:[%s596_s1 + $0x68] sm:$0x1]  ;;  %vm149_vm5 = vcmask 121856   ;;  %vm277_vm6 = vcmask 1040384  }
   0x4   :  { %473 = vmatprep.subr.msk.mxu0 %vm35_vm0, %v27_v3  ;;  %v127_v8 = vld [vmem:[%s596_s1 + $0x60] sm:$0xff]  ;;  %v358_v13 = vld [vmem:[%s596_s1 + $0x78] sm:$0x1]  ;;  %vm490_vm4 = vmpackc.low %vm162_vm2, %vm514_vm3  ;;  %vm273_vm8 = vcmask 203776   ;;  %vm368_vm9 = vcmask 1044480   ;;  %vm364_vm10 = vcmask 39936  }
   0x5   :  { %474 = vmatpush1.msk.msra.mxu0 %vm35_vm0, %v11_v0  ;;  %v121_v30 = vld [vmem:[%s596_s1 + $0x10] sm:$0xff]  ;;  %v122_v31 = vld [vmem:[%s596_s1 + $0x18] sm:$0xff]  ;;  %v123_v32 = vld [vmem:[%s596_s1 + $0x20] sm:$0xff] }
   0x6   :  { %475 = vmatmul.mubr.msk.f32.vlgmr.msra.gmra.mrb[0].mxu0 %vm28_vm1, %v12_v5  ;;  %v124_v33 = vld [vmem:[%s596_s1 + $0x28] sm:$0x1]  ;;  %vm500_vm7 = vmpackc.low %vm277_vm6, %vm514_vm3  ;;  %v266_v3 = vld [vmem:[%s596_s1 + $0x30] sm:$0x1f] }
   0x7   :  { %110 = vmatprep.mubr.f32.mxu0 %v512_v1  ;;  %23 = vperm.xlu0 %509, %v15_v6  }
   0x8   :  { %136 = vperm.xlu1 %510, %v126_v11   ;;  %v357_v11 = vld [vmem:[%s596_s1 + $0x38] sm:$0x1] }
   0xa   :  { %476 = vmatmul.mubr.msk.f32.gmra.mrb[2].mxu0 %vm28_vm1, %v13_v7 }
   0xb   :  { %141 = vperm.xlu0 %509, %v127_v8   ;;  %348 = vmatprep.mubr.f32.mxu0 %v512_v1 }
   0xc   :  { %146 = vperm.xlu1 %510, %v128_v12   ;;  %v515_v12 = vmov 1966171168  }
   0xf   :  { %270 = vperm.xlu0 %509, %v267_v9  }
  0x10   :  { %361 = vperm.xlu1 %510, %v358_v13   ;;  %v450_v13 = vunpack.c.l.s4 %v515_v12 }
  0x82   :  { %v19_v14 = vpop.permute.xlu0 %18  ;;  %v132_v34 = vpop.permute.xlu1 %131 }
  0x86   :  { %v24_v18 = vpop.permute.xlu0 %23 }
  0x87   :  { %v137_v38 = vpop.permute.xlu1 %136 }
  0x8a   :  { %v142_v51 = vpop.permute.xlu0 %141 }
  0x8b   :  { %v147_v54 = vpop.permute.xlu1 %146 }
  0x8e   :  { %v271_v4 = vpop.permute.xlu0 %270 }
  0xd9   :  { %v106_v15 = vpop.f32.mrb[0].mxu0 }
  0xda   :  { %v108_v16 = vpop.f32.mrb[1].mxu0  ;;  %v107_v17 = vadd.f32 %v106_v15, %v19_v14 }
  0xdb   :  { %v109_v19 = vadd.f32 %v108_v16, %v19_v14  ;;  %v452_v14 = vlaneseq  ;;  %v362_v16 = vpop.permute.xlu1 %361 }
  0xdc   :  { %v117_v24 = vmax.f32 %v107_v17, 0.0 }
  0xdd   :  { %v112_v20 = vpop.f32.mrb[2].mxu0  ;;  %v118_v26 = vmax.f32 %v109_v19, 0.0  ;;  %v453_v15 = vshrl.u32 %v452_v14, 7  ;;  %vm466_vm11 = vcmp.lt.s32.totalorder %v452_v14, 256 }
  0xde   :  { %v113_v21 = vadd.f32 %v112_v20, %v24_v18  ;;  %v114_v22 = vpop.f32.mrb[3].mxu0 }
  0xdf   :  { %v115_v23 = vadd.f32 %v114_v22, %v24_v18 }
  0xe0   :  { %v119_v25 = vmax.f32 %v113_v21, 0.0 }
  0xe1   :  { %v120_v27 = vmax.f32 %v115_v23, 0.0 }
  0xe2   :  { %v492_v28 = vpack.c.bf16 %v119_v25, %v117_v24 }
  0xe3   :  { %v489_v29 = vpack.c.bf16 %v120_v27, %v118_v26 }
  0xe5   :  { %491 = vmatprep.subr.msk.bf16.mxu1 %vm490_vm4, %v489_v29 }
  0xe6   :  { %494 = vmatpush1.bf16.msk.msra.mxu1 %vm490_vm4, %v492_v28 }
  0xe9   :  { %479 = vmatmul.mubr.msk.f32.vlgmr.msra.gmra.mrb[0].mxu1 %vm149_vm5, %v121_v30 }
  0xea   :  { %239 = vmatprep.mubr.f32.mxu1 %v512_v1 }
  0xed   :  { %480 = vmatmul.mubr.msk.f32.gmra.mrb[2].mxu1 %vm149_vm5, %v122_v31 }
  0xee   :  { %245 = vmatprep.mubr.f32.mxu1 %v512_v1 }
  0xf1   :  { %481 = vmatmul.mubr.msk.f32.gmra.mrb[4].mxu1 %vm149_vm5, %v123_v32 }
  0xf2   :  { %251 = vmatprep.mubr.f32.mxu1 %v512_v1 }
  0xf5   :  { %482 = vmatmul.mubr.msk.f32.gmra.mrb[6].mxu1 %vm149_vm5, %v124_v33 }
 0x1bc   :  { %v235_v35 = vpop.f32.mrb[0].mxu1 }
 0x1bd   :  { %v237_v36 = vpop.f32.mrb[1].mxu1  ;;  %v236_v37 = vadd.f32 %v235_v35, %v132_v34 }
 0x1be   :  { %v238_v39 = vadd.f32 %v237_v36, %v132_v34 }
 0x1bf   :  { %v258_v44 = vmax.f32 %v236_v37, 0.0 }
 0x1c0   :  { %v241_v40 = vpop.f32.mrb[2].mxu1  ;;  %v259_v46 = vmax.f32 %v238_v39, 0.0 }
 0x1c1   :  { %v242_v41 = vadd.f32 %v241_v40, %v137_v38  ;;  %v243_v42 = vpop.f32.mrb[3].mxu1 }
 0x1c2   :  { %v244_v43 = vadd.f32 %v243_v42, %v137_v38 }
 0x1c3   :  { %v260_v45 = vmax.f32 %v242_v41, 0.0 }
 0x1c4   :  { %v261_v47 = vmax.f32 %v244_v43, 0.0  ;;  %v247_v48 = vpop.f32.mrb[4].mxu1 }
 0x1c5   :  { %v497_v49 = vpack.c.bf16 %v260_v45, %v258_v44  ;;  %v249_v50 = vpop.f32.mrb[5].mxu1  ;;  %v248_v53 = vadd.f32 %v247_v48, %v142_v51 }
 0x1c6   :  { %v495_v52 = vpack.c.bf16 %v261_v47, %v259_v46  ;;  %v250_v55 = vadd.f32 %v249_v50, %v142_v51 }
 0x1c7   :  { %v262_v60 = vmax.f32 %v248_v53, 0.0 }
 0x1c8   :  { %v253_v56 = vpop.f32.mrb[6].mxu1  ;;  %496 = vmatprep.subr.bf16.mxu0 %v495_v52  ;;  %v263_v62 = vmax.f32 %v250_v55, 0.0 }
 0x1c9   :  { %v254_v57 = vadd.f32 %v253_v56, %v147_v54  ;;  %v255_v58 = vpop.f32.mrb[7].mxu1  ;;  %498 = vmatpush1.bf16.msra.mxu0 %v497_v49 }
 0x1ca   :  { %v256_v59 = vadd.f32 %v255_v58, %v147_v54 }
 0x1cb   :  { %v264_v61 = vmax.f32 %v254_v57, 0.0 }
 0x1cc   :  { %v265_v63 = vmax.f32 %v256_v59, 0.0 }
 0x1cd   :  { %v502_v0 = vpack.c.bf16 %v264_v61, %v262_v60 }
 0x1ce   :  { %v499_v2 = vpack.c.bf16 %v265_v63, %v263_v62 }
 0x1d0   :  { %501 = vmatprep.subr.msk.bf16.mxu0 %vm500_vm7, %v499_v2 }
 0x1d1   :  { %504 = vmatpush1.bf16.msk.msra.mxu0 %vm500_vm7, %v502_v0 }
 0x1d4   :  { %485 = vmatmul.mubr.msk.f32.vlgmr.msra.gmra.mrb[4].mxu0 %vm273_vm8, %v266_v3 }
 0x1d5   :  { %439 = vmatprep.mubr.f32.mxu0 %v512_v1  ;;  %v451_v1 = vunpack.c.0.s8 %v450_v13 }
 0x1d7   :  { %v454_v21 = vsub.s32 %v451_v1, %v453_v15 }
 0x2a7   :  { %v350_v5 = vpop.f32.mrb[4].mxu0 }
 0x2a8   :  { %v351_v6 = vadd.f32 %v350_v5, %v271_v4  ;;  %v352_v7 = vpop.f32.mrb[5].mxu0 }
 0x2a9   :  { %v353_v8 = vadd.f32 %v352_v7, %v271_v4 }
 0x2aa   :  { %v355_v10 = vmax.f32 %v351_v6, 0.0 }
 0x2ab   :  { %v356_v9 = vmax.f32 %v353_v8, 0.0 }
 0x2ad   :  { %486 = vmatprep.subr.msk.mxu0 %vm368_vm9, %v356_v9 }
 0x2ae   :  { %487 = vmatpush1.msk.msra.mxu0 %vm368_vm9, %v355_v10 }
 0x2af   :  { %488 = vmatmul.mubr.msk.f32.vlgmr.msra.gmra.mrb[6].mxu0 %vm364_vm10, %v357_v11 }
 0x382   :  { %v441_v17 = vpop.f32.mrb[6].mxu0 }
 0x383   :  { %v442_v18 = vadd.f32 %v441_v17, %v362_v16  ;;  %v443_v19 = vpop.f32.mrb[7].mxu0 }
 0x384   :  { %v444_v20 = vadd.f32 %v443_v19, %v362_v16 }
 0x386   :  { %v448_v22 = vcombine.low %v442_v18, %v444_v20 }
 0x388   :  { %v455_v23 = vrot.slane %v448_v22, %v454_v21 }
 0x38a   :  { %v462_v24 = vrot.slane %v455_v23, %v454_v21 }
 0x38c   :  { %468 = vst.msk [vmem:[%s597_s2] sm:$0x3] %vm466_vm11, %v462_v24 }

</bundles_post_ra>
